<compile_context>
chip_gen: v7x
topology: tpu7x:2x2x1
jax: 0.10.0
libtpu: 0.0.40
codegen_flags: <defaults>
</compile_context>

<pallas_src>
import functools

import jax
import jax.numpy as jnp
from jax.experimental import pallas as pl
from jax.experimental.pallas import tpu as pltpu


def _round_up(n, m):
    return ((n + m - 1) // m) * m


def mlp_kernel(x_ref, w1_ref, b1_ref, w2_ref, b2_ref,
               w3_ref, b3_ref, w4_ref, b4_ref, o_ref):
    # Fused 4-layer MLP on one (bb, F) activation tile; weights stay resident
    # in VMEM across the whole grid. Matmul operands are bf16 (MXU-native on
    # v5e/v6e/v7x); accumulation and the bias adds stay in f32.
    x = x_ref[...].astype(jnp.bfloat16)
    h = jnp.dot(x, w1_ref[...],
                preferred_element_type=jnp.float32) + b1_ref[...]
    h = jnp.dot(h.astype(jnp.bfloat16), w2_ref[...],
                preferred_element_type=jnp.float32) + b2_ref[...]
    h = jnp.dot(h.astype(jnp.bfloat16), w3_ref[...],
                preferred_element_type=jnp.float32) + b3_ref[...]
    h = jnp.dot(h.astype(jnp.bfloat16), w4_ref[...],
                preferred_element_type=jnp.float32) + b4_ref[...]
    o_ref[...] = h.astype(o_ref.dtype)


def prepare_params(params):
    """One-time parameter prep, hoisted out of the per-call forward path.

    * Weights are stored as (in_features, out_features), zero-padded so every
      matmul OUTPUT dim is a multiple of 128 (lane-dense stores / full MXU
      tiles), then cast to bf16. Zero padding is exact: padded hidden columns
      stay 0 and padded weight rows only ever multiply those zeros.
    * Biases stay f32 (bias add is done in f32 in the kernel).
    * The input feature dim (784) is deliberately NOT padded — it is a
      multiple of 16 and is used as a full-array-dim block, so x needs no
      per-call padding copy.
    """
    w1, b1, w2, b2, w3, b3, w4, b4 = params
    H = w1.shape[1]
    C = w4.shape[1]
    H_pad = _round_up(H, 128)
    C_pad = _round_up(C, 128)

    w1p = jnp.pad(w1, ((0, 0), (0, H_pad - H))).astype(jnp.bfloat16)
    w2p = jnp.pad(w2, ((0, H_pad - H), (0, H_pad - H))).astype(jnp.bfloat16)
    w3p = jnp.pad(w3, ((0, H_pad - H), (0, H_pad - H))).astype(jnp.bfloat16)
    w4p = jnp.pad(w4, ((0, H_pad - H), (0, C_pad - C))).astype(jnp.bfloat16)
    b1p = jnp.pad(b1.reshape(1, -1).astype(jnp.float32), ((0, 0), (0, H_pad - H)))
    b2p = jnp.pad(b2.reshape(1, -1).astype(jnp.float32), ((0, 0), (0, H_pad - H)))
    b3p = jnp.pad(b3.reshape(1, -1).astype(jnp.float32), ((0, 0), (0, H_pad - H)))
    b4p = jnp.pad(b4.reshape(1, -1).astype(jnp.float32), ((0, 0), (0, C_pad - C)))
    return (w1p, b1p, w2p, b2p, w3p, b3p, w4p, b4p)


@functools.partial(jax.jit, static_argnames=("num_classes", "block_b"))
def mlp_forward(x, prepared, *, num_classes, block_b=512):
    """x: (B, C, H, W) NCHW (or already (B, F)). Returns (B, num_classes) f32."""
    w1p, b1p, w2p, b2p, w3p, b3p, w4p, b4p = prepared
    B = x.shape[0]
    x2d = x.reshape(B, -1)                     # glue reshape (matches torch.reshape)
    if x2d.dtype != jnp.float32:
        x2d = x2d.astype(jnp.float32)
    F_in = x2d.shape[1]
    assert F_in == w1p.shape[0], "input feature dim must match W1"
    H_pad = w1p.shape[1]
    C_pad = w4p.shape[1]

    # Batch tile: large by default (weights are resident, so bigger M tiles
    # amortize grid-step overhead and MXU fill/drain); multiple of 8 sublanes;
    # clamped for tiny batches.
    bb = max(8, min(_round_up(block_b, 8), _round_up(B, 8)))
    # v7x megacore: prefer >=2 grid steps so ("parallel",) can split the batch
    # axis across both TensorCores instead of leaving one idle.
    if _round_up(B, bb) // bb < 2 and B > 8:
        bb = max(8, _round_up((B + 1) // 2, 8))
    B_pad = _round_up(B, bb)

    # Only pad the batch (if needed) — the feature dim stays at its natural
    # size, so in the common case (B % bb == 0) x is passed through untouched.
    x_p = x2d if B_pad == B else jnp.pad(x2d, ((0, B_pad - B), (0, 0)))

    grid = (B_pad // bb,)

    def row_map(i):       # activations / output: tiled over batch
        return (i, 0)

    def full_map(i):      # weights / biases: same full block every step
        return (0, 0)

    def resident(shape):
        # Constant index_map across the grid -> a single VMEM buffer suffices;
        # avoids double-buffering every weight copy (VMEM headroom on v7x).
        return pl.BlockSpec(shape, full_map, pipeline_mode=pl.Buffered(1))

    out = pl.pallas_call(
        mlp_kernel,
        out_shape=jax.ShapeDtypeStruct((B_pad, C_pad), jnp.float32),
        grid_spec=pltpu.PrefetchScalarGridSpec(
            num_scalar_prefetch=0,
            grid=grid,
            in_specs=[
                pl.BlockSpec((bb, F_in), row_map),       # x tile (f32 in HBM)
                resident((F_in, H_pad)),                 # W1 (bf16)
                resident((1, H_pad)),                    # b1 (f32)
                resident((H_pad, H_pad)),                # W2 (bf16)
                resident((1, H_pad)),                    # b2 (f32)
                resident((H_pad, H_pad)),                # W3 (bf16)
                resident((1, H_pad)),                    # b3 (f32)
                resident((H_pad, C_pad)),                # W4 (bf16)
                resident((1, C_pad)),                    # b4 (f32)
            ],
            out_specs=pl.BlockSpec((bb, C_pad), row_map),
        ),
        compiler_params=pltpu.CompilerParams(
            dimension_semantics=("parallel",),           # megacore sharding on v7x
            vmem_limit_bytes=48 * 1024 * 1024,           # v7x-safe; ample for these tiles
        ),
    )(x_p, w1p, b1p, w2p, b2p, w3p, b3p, w4p, b4p)

    # Slice the logical result back out of the padded slab.
    return out[:B, :num_classes]


def init_params(key, image_size, hidden_size, num_classes):
    """Deterministic init mimicking nn.Linear default (uniform +/- 1/sqrt(fan_in)).
    Weights stored as (in_features, out_features); biases as (out_features,)."""
    dims = [(image_size * image_size, hidden_size),
            (hidden_size, hidden_size),
            (hidden_size, hidden_size),
            (hidden_size, num_classes)]
    params = []
    for fan_in, fan_out in dims:
        key, kw, kb = jax.random.split(key, 3)
        bound = 1.0 / (fan_in ** 0.5)
        w = jax.random.uniform(kw, (fan_in, fan_out), jnp.float32, -bound, bound)
        b = jax.random.uniform(kb, (fan_out,), jnp.float32, -bound, bound)
        params += [w, b]
    return tuple(params)


if __name__ == "__main__":
    # Small shapes consistent with the module's forward pass.
    batch = 8
    image_size = 28         # -> 784 input features
    hidden_size = 32        # scaled-down hidden (module default 500)
    num_classes = 10

    key = jax.random.PRNGKey(0)
    kp, kx = jax.random.split(key)
    params = init_params(kp, image_size, hidden_size, num_classes)
    prepared = prepare_params(params)        # one-time prep, not in the hot path

    x = jax.random.normal(kx, (batch, 1, image_size, image_size), jnp.float32)

    y = mlp_forward(x, prepared, num_classes=num_classes)
    y = jax.block_until_ready(y)

    # Pure-JAX f32 reference. The kernel uses bf16 matmul operands with f32
    # accumulation, so the comparison uses a correspondingly loose tolerance.
    w1, b1, w2, b2, w3, b3, w4, b4 = params
    ref = x.reshape(batch, -1)
    ref = ref @ w1 + b1
    ref = ref @ w2 + b2
    ref = ref @ w3 + b3
    ref = ref @ w4 + b4
    assert y.shape == (batch, num_classes)
    assert jnp.allclose(y, ref, atol=3e-2, rtol=3e-2), float(jnp.max(jnp.abs(y - ref)))

    print("KERNEL_OK")
</pallas_src>

<mosaic_0001>
module attributes {stable_mosaic.version = 11 : i64} {
  func.func @mlp_kernel(%arg0: i32, %arg1: memref<8x784xf32, #tpu.memory_space<vmem>>, %arg2: memref<784x128xbf16, #tpu.memory_space<vmem>>, %arg3: memref<1x128xf32, #tpu.memory_space<vmem>>, %arg4: memref<128x128xbf16, #tpu.memory_space<vmem>>, %arg5: memref<1x128xf32, #tpu.memory_space<vmem>>, %arg6: memref<128x128xbf16, #tpu.memory_space<vmem>>, %arg7: memref<1x128xf32, #tpu.memory_space<vmem>>, %arg8: memref<128x128xbf16, #tpu.memory_space<vmem>>, %arg9: memref<1x128xf32, #tpu.memory_space<vmem>>, %arg10: memref<8x128xf32, #tpu.memory_space<vmem>>) attributes {dimension_semantics = [#tpu.dimension_semantics<parallel>], iteration_bounds = array<i64: 1>, scalar_prefetch = 0 : i64, scratch_operands = 0 : i64, tpu.core_type = #tpu.core_type<tc>, window_params = [{transform_indices = @transform_0, window_bounds = array<i64: 8, 784>}, {pipeline_mode = #tpu.pipeline_mode<synchronous>, transform_indices = @transform_1, window_bounds = array<i64: 784, 128>}, {pipeline_mode = #tpu.pipeline_mode<synchronous>, transform_indices = @transform_2, window_bounds = array<i64: 1, 128>}, {pipeline_mode = #tpu.pipeline_mode<synchronous>, transform_indices = @transform_3, window_bounds = array<i64: 128, 128>}, {pipeline_mode = #tpu.pipeline_mode<synchronous>, transform_indices = @transform_4, window_bounds = array<i64: 1, 128>}, {pipeline_mode = #tpu.pipeline_mode<synchronous>, transform_indices = @transform_5, window_bounds = array<i64: 128, 128>}, {pipeline_mode = #tpu.pipeline_mode<synchronous>, transform_indices = @transform_6, window_bounds = array<i64: 1, 128>}, {pipeline_mode = #tpu.pipeline_mode<synchronous>, transform_indices = @transform_7, window_bounds = array<i64: 128, 128>}, {pipeline_mode = #tpu.pipeline_mode<synchronous>, transform_indices = @transform_8, window_bounds = array<i64: 1, 128>}, {transform_indices = @transform_9, window_bounds = array<i64: 8, 128>}]} {
    %c0 = arith.constant 0 : index
    %c0_0 = arith.constant 0 : index
    %0 = vector.load %arg1[%c0, %c0_0] : memref<8x784xf32, #tpu.memory_space<vmem>>, vector<8x784xf32>
    %1 = arith.truncf %0 : vector<8x784xf32> to vector<8x784xbf16>
    %c0_1 = arith.constant 0 : index
    %c0_2 = arith.constant 0 : index
    %2 = vector.load %arg2[%c0_1, %c0_2] : memref<784x128xbf16, #tpu.memory_space<vmem>>, vector<784x128xbf16>
    %cst = arith.constant dense<0.000000e+00> : vector<8x128xf32>
    %3 = tpu.matmul %1, %2, %cst {dimension_numbers = #tpu.dot_dimension_numbers<[1], [0], [0], [1], [0, 0, 1, 1], [], []>} : vector<8x784xbf16>, vector<784x128xbf16>, vector<8x128xf32> -> vector<8x128xf32>
    %c0_3 = arith.constant 0 : index
    %c0_4 = arith.constant 0 : index
    %4 = vector.load %arg3[%c0_3, %c0_4] : memref<1x128xf32, #tpu.memory_space<vmem>>, vector<1x128xf32>
    %5 = vector.broadcast %4 : vector<1x128xf32> to vector<8x128xf32>
    %6 = arith.addf %3, %5 : vector<8x128xf32>
    %7 = arith.truncf %6 : vector<8x128xf32> to vector<8x128xbf16>
    %c0_5 = arith.constant 0 : index
    %c0_6 = arith.constant 0 : index
    %8 = vector.load %arg4[%c0_5, %c0_6] : memref<128x128xbf16, #tpu.memory_space<vmem>>, vector<128x128xbf16>
    %cst_7 = arith.constant dense<0.000000e+00> : vector<8x128xf32>
    %9 = tpu.matmul %7, %8, %cst_7 {dimension_numbers = #tpu.dot_dimension_numbers<[1], [0], [0], [1], [0, 0, 1, 1], [], []>} : vector<8x128xbf16>, vector<128x128xbf16>, vector<8x128xf32> -> vector<8x128xf32>
    %c0_8 = arith.constant 0 : index
    %c0_9 = arith.constant 0 : index
    %10 = vector.load %arg5[%c0_8, %c0_9] : memref<1x128xf32, #tpu.memory_space<vmem>>, vector<1x128xf32>
    %11 = vector.broadcast %10 : vector<1x128xf32> to vector<8x128xf32>
    %12 = arith.addf %9, %11 : vector<8x128xf32>
    %13 = arith.truncf %12 : vector<8x128xf32> to vector<8x128xbf16>
    %c0_10 = arith.constant 0 : index
    %c0_11 = arith.constant 0 : index
    %14 = vector.load %arg6[%c0_10, %c0_11] : memref<128x128xbf16, #tpu.memory_space<vmem>>, vector<128x128xbf16>
    %cst_12 = arith.constant dense<0.000000e+00> : vector<8x128xf32>
    %15 = tpu.matmul %13, %14, %cst_12 {dimension_numbers = #tpu.dot_dimension_numbers<[1], [0], [0], [1], [0, 0, 1, 1], [], []>} : vector<8x128xbf16>, vector<128x128xbf16>, vector<8x128xf32> -> vector<8x128xf32>
    %c0_13 = arith.constant 0 : index
    %c0_14 = arith.constant 0 : index
    %16 = vector.load %arg7[%c0_13, %c0_14] : memref<1x128xf32, #tpu.memory_space<vmem>>, vector<1x128xf32>
    %17 = vector.broadcast %16 : vector<1x128xf32> to vector<8x128xf32>
    %18 = arith.addf %15, %17 : vector<8x128xf32>
    %19 = arith.truncf %18 : vector<8x128xf32> to vector<8x128xbf16>
    %c0_15 = arith.constant 0 : index
    %c0_16 = arith.constant 0 : index
    %20 = vector.load %arg8[%c0_15, %c0_16] : memref<128x128xbf16, #tpu.memory_space<vmem>>, vector<128x128xbf16>
    %cst_17 = arith.constant dense<0.000000e+00> : vector<8x128xf32>
    %21 = tpu.matmul %19, %20, %cst_17 {dimension_numbers = #tpu.dot_dimension_numbers<[1], [0], [0], [1], [0, 0, 1, 1], [], []>} : vector<8x128xbf16>, vector<128x128xbf16>, vector<8x128xf32> -> vector<8x128xf32>
    %c0_18 = arith.constant 0 : index
    %c0_19 = arith.constant 0 : index
    %22 = vector.load %arg9[%c0_18, %c0_19] : memref<1x128xf32, #tpu.memory_space<vmem>>, vector<1x128xf32>
    %23 = vector.broadcast %22 : vector<1x128xf32> to vector<8x128xf32>
    %24 = arith.addf %21, %23 : vector<8x128xf32>
    %c0_20 = arith.constant 0 : index
    %c0_21 = arith.constant 0 : index
    %25 = vector.load %arg10[%c0_20, %c0_21] : memref<8x128xf32, #tpu.memory_space<vmem>>, vector<8x128xf32>
    tpu.vector_store %arg10[%c0_20, %c0_21], %24 {strides = array<i32>} : memref<8x128xf32, #tpu.memory_space<vmem>>, vector<8x128xf32>,
    return
  }
  func.func @transform_0(%arg0: i32) -> (i32, i32) {
    %c0_i32 = arith.constant 0 : i32
    %c0_i32_0 = arith.constant 0 : i32
    return %arg0, %c0_i32 : i32, i32
  }
  func.func @transform_1(%arg0: i32) -> (i32, i32) {
    %c0_i32 = arith.constant 0 : i32
    %c0_i32_0 = arith.constant 0 : i32
    %c0_i32_1 = arith.constant 0 : i32
    return %c0_i32, %c0_i32_0 : i32, i32
  }
  func.func @transform_2(%arg0: i32) -> (i32, i32) {
    %c0_i32 = arith.constant 0 : i32
    %c0_i32_0 = arith.constant 0 : i32
    %c0_i32_1 = arith.constant 0 : i32
    return %c0_i32, %c0_i32_0 : i32, i32
  }
  func.func @transform_3(%arg0: i32) -> (i32, i32) {
    %c0_i32 = arith.constant 0 : i32
    %c0_i32_0 = arith.constant 0 : i32
    %c0_i32_1 = arith.constant 0 : i32
    return %c0_i32, %c0_i32_0 : i32, i32
  }
  func.func @transform_4(%arg0: i32) -> (i32, i32) {
    %c0_i32 = arith.constant 0 : i32
    %c0_i32_0 = arith.constant 0 : i32
    %c0_i32_1 = arith.constant 0 : i32
    return %c0_i32, %c0_i32_0 : i32, i32
  }
  func.func @transform_5(%arg0: i32) -> (i32, i32) {
    %c0_i32 = arith.constant 0 : i32
    %c0_i32_0 = arith.constant 0 : i32
    %c0_i32_1 = arith.constant 0 : i32
    return %c0_i32, %c0_i32_0 : i32, i32
  }
  func.func @transform_6(%arg0: i32) -> (i32, i32) {
    %c0_i32 = arith.constant 0 : i32
    %c0_i32_0 = arith.constant 0 : i32
    %c0_i32_1 = arith.constant 0 : i32
    return %c0_i32, %c0_i32_0 : i32, i32
  }
  func.func @transform_7(%arg0: i32) -> (i32, i32) {
    %c0_i32 = arith.constant 0 : i32
    %c0_i32_0 = arith.constant 0 : i32
    %c0_i32_1 = arith.constant 0 : i32
    return %c0_i32, %c0_i32_0 : i32, i32
  }
  func.func @transform_8(%arg0: i32) -> (i32, i32) {
    %c0_i32 = arith.constant 0 : i32
    %c0_i32_0 = arith.constant 0 : i32
    %c0_i32_1 = arith.constant 0 : i32
    return %c0_i32, %c0_i32_0 : i32, i32
  }
  func.func @transform_9(%arg0: i32) -> (i32, i32) {
    %c0_i32 = arith.constant 0 : i32
    %c0_i32_0 = arith.constant 0 : i32
    return %arg0, %c0_i32 : i32, i32
  }
}

</mosaic_0001>

<bundles_post_ra>
// kernel: mlp_forward.1
= control target key start
LH: loop header
LB: loop body
LE: loop exit
PB: predicated region body
PF: predicated region fallthrough
CT: control target
= control target key end

     0   :  { %v1301_v44 = vmov 0.0   ;;  %vm1302_vm0 = vmmov 0   ;;  %vm447_vm1 = vcmask 130048   ;;  %s1651_s0 = inlined_call_operand.vmem [shape: f32[8,784], index: 0, kind: input, shape index: {}]   ;;  %s1652_s1 = inlined_call_operand.vmem [shape: bf16[784,128], index: 1, kind: input, shape index: {}]   ;;  %s1653_s2 = inlined_call_operand.vmem [shape: f32[1,128], index: 2, kind: input, shape index: {}]   ;;  %s1654_s3 = inlined_call_operand.vmem [shape: bf16[128,128], index: 3, kind: input, shape index: {}]   ;;  %s1655_s4 = inlined_call_operand.vmem [shape: f32[1,128], index: 4, kind: input, shape index: {}]   ;;  %s1656_s5 = inlined_call_operand.vmem [shape: bf16[128,128], index: 5, kind: input, shape index: {}]   ;;  %s1657_s6 = inlined_call_operand.vmem [shape: f32[1,128], index: 6, kind: input, shape index: {}]   ;;  %s1658_s7 = inlined_call_operand.vmem [shape: bf16[128,128], index: 7, kind: input, shape index: {}]   ;;  %s1659_s8 = inlined_call_operand.vmem [shape: f32[1,128], index: 8, kind: input, shape index: {}]   ;;  %s1660_s9 = inlined_call_operand.hbm [shape: f32[8,128], index: 9, kind: output, shape index: {}]  }
   0x1   :  { %v1204_v0 = vld [vmem:[%s1652_s1 + $0x40] sm:$0xff]   ;;  %v1208_v4 = vld [vmem:[%s1652_s1 + $0x48] sm:$0xff]   ;;  %v1212_v8 = vld [vmem:[%s1652_s1 + $0x50] sm:$0xff]  }
   0x2   :  { %v1205_v1 = vld [vmem:[%s1652_s1] sm:$0xff]   ;;  %1040 = vmatprep.subr.bf16.mxu0 %v1204_v0  ;;  %v1209_v5 = vld [vmem:[%s1652_s1 + $0x8] sm:$0xff]   ;;  %v1213_v9 = vld [vmem:[%s1652_s1 + $0x10] sm:$0xff]  }
   0x3   :  { %v1206_v2 = vld [vmem:[%s1652_s1 + $0xc0] sm:$0xff]   ;;  %1041 = vmatpush3.bf16.msra.mxu0 %v1205_v1  ;;  %v1210_v6 = vld [vmem:[%s1652_s1 + $0xc8] sm:$0xff]   ;;  %v1214_v10 = vld [vmem:[%s1652_s1 + $0xd0] sm:$0xff]  }
   0x4   :  { %v1207_v3 = vld [vmem:[%s1652_s1 + $0x80] sm:$0xff]   ;;  %1062 = vmatprep.subr.bf16.mxu1 %v1206_v2  ;;  %1042 = vmatprep.subr.bf16.mxu0 %v1208_v4  ;;  %v1211_v7 = vld [vmem:[%s1652_s1 + $0x88] sm:$0xff]   ;;  %v1215_v11 = vld [vmem:[%s1652_s1 + $0x90] sm:$0xff]  }
   0x5   :  { %1063 = vmatpush3.bf16.msra.mxu1 %v1207_v3  ;;  %v1216_v12 = vld [vmem:[%s1652_s1 + $0x58] sm:$0xff]   ;;  %v1220_v16 = vld [vmem:[%s1652_s1 + $0x60] sm:$0xff]   ;;  %v1224_v20 = vld [vmem:[%s1652_s1 + $0x68] sm:$0xff]  }
   0x6   :  { %1064 = vmatprep.subr.bf16.mxu1 %v1210_v6  ;;  %v1217_v13 = vld [vmem:[%s1652_s1 + $0x18] sm:$0xff]   ;;  %v1221_v17 = vld [vmem:[%s1652_s1 + $0x20] sm:$0xff]   ;;  %v1225_v21 = vld [vmem:[%s1652_s1 + $0x28] sm:$0xff]  }
   0x7   :  { %1043 = vmatpush3.bf16.msra.mxu0 %v1209_v5  ;;  %v1218_v14 = vld [vmem:[%s1652_s1 + $0xd8] sm:$0xff]   ;;  %v1222_v18 = vld [vmem:[%s1652_s1 + $0xe0] sm:$0xff]   ;;  %v1226_v22 = vld [vmem:[%s1652_s1 + $0xe8] sm:$0xff]  }
   0x8   :  { %1044 = vmatprep.subr.bf16.mxu0 %v1212_v8  ;;  %v1219_v15 = vld [vmem:[%s1652_s1 + $0x98] sm:$0xff]   ;;  %v1223_v19 = vld [vmem:[%s1652_s1 + $0xa0] sm:$0xff]   ;;  %v1227_v23 = vld [vmem:[%s1652_s1 + $0xa8] sm:$0xff]  }
   0x9   :  { %1065 = vmatpush3.bf16.msra.mxu1 %v1211_v7  ;;  %v1228_v24 = vld [vmem:[%s1652_s1 + $0x70] sm:$0xff]   ;;  %v1232_v28 = vld [vmem:[%s1652_s1 + $0x78] sm:$0xff]   ;;  %v35_v31 = vld [vmem:[%s1651_s0 + $0x8] sm:$0xff] }
   0xa   :  { %1066 = vmatprep.subr.bf16.mxu1 %v1214_v10  ;;  %v1229_v25 = vld [vmem:[%s1652_s1 + $0x30] sm:$0xff]   ;;  %v1233_v29 = vld [vmem:[%s1652_s1 + $0x38] sm:$0xff]   ;;  %v42_v32 = vpack.c.bf16 %v35_v31, %v35_v31  ;;  %v34_v34 = vld [vmem:[%s1651_s0] sm:$0xff] }
   0xb   :  { %1045 = vmatpush3.bf16.msra.mxu0 %v1213_v9  ;;  %v1230_v26 = vld [vmem:[%s1652_s1 + $0xf0] sm:$0xff]   ;;  %v1234_v30 = vld [vmem:[%s1652_s1 + $0xf8] sm:$0xff]   ;;  %v41_v35 = vpack.c.bf16 %v34_v34, %v34_v34  ;;  %v1236_v36 = vld [vmem:[%s1652_s1 + $0x140] sm:$0xff]  }
   0xc   :  { %1046 = vmatprep.subr.bf16.mxu0 %v1216_v12  ;;  %v1231_v27 = vld [vmem:[%s1652_s1 + $0xb0] sm:$0xff]   ;;  %v1235_v33 = vld [vmem:[%s1652_s1 + $0xb8] sm:$0xff]   ;;  %483 = vmatprep.mubr.bf16.mxu0 %v42_v32  ;;  %v1237_v39 = vld [vmem:[%s1652_s1 + $0x100] sm:$0xff]  }
   0xd   :  { %1067 = vmatpush3.bf16.msra.mxu1 %v1215_v11  ;;  %v37_v37 = vld [vmem:[%s1651_s0 + $0x18] sm:$0xff]  ;;  %v36_v40 = vld [vmem:[%s1651_s0 + $0x10] sm:$0xff]  ;;  %v1238_v42 = vld [vmem:[%s1652_s1 + $0x148] sm:$0xff]  }
   0xe   :  { %1068 = vmatprep.subr.bf16.mxu1 %v1218_v14  ;;  %v44_v38 = vpack.c.bf16 %v37_v37, %v37_v37  ;;  %v43_v41 = vpack.c.bf16 %v36_v40, %v36_v40  ;;  %v1239_v43 = vld [vmem:[%s1652_s1 + $0x108] sm:$0xff]   ;;  %v1240_v45 = vld [vmem:[%s1652_s1 + $0x150] sm:$0xff]   ;;  %v1242_v47 = vld [vmem:[%s1652_s1 + $0x158] sm:$0xff]  }
   0xf   :  { %1047 = vmatpush3.bf16.msra.mxu0 %v1217_v13  ;;  %v1241_v46 = vld [vmem:[%s1652_s1 + $0x110] sm:$0xff]   ;;  %v1243_v48 = vld [vmem:[%s1652_s1 + $0x118] sm:$0xff]   ;;  %v1244_v49 = vld [vmem:[%s1652_s1 + $0x160] sm:$0xff]  }
  0x10   :  { %1048 = vmatprep.subr.bf16.mxu0 %v1220_v16  ;;  %523 = vmatprep.mubr.bf16.mxu1 %v44_v38  ;;  %v1245_v50 = vld [vmem:[%s1652_s1 + $0x120] sm:$0xff]   ;;  %v1246_v51 = vld [vmem:[%s1652_s1 + $0x168] sm:$0xff]   ;;  %v1248_v55 = vld [vmem:[%s1652_s1 + $0x170] sm:$0xff]  }
  0x11   :  { %1069 = vmatpush3.bf16.msra.mxu1 %v1219_v15  ;;  %v1247_v52 = vld [vmem:[%s1652_s1 + $0x128] sm:$0xff]   ;;  %v1252_v53 = vld [vmem:[%s1652_s1 + $0x180] sm:$0xff]   ;;  %v40_v57 = vld [vmem:[%s1651_s0 + $0x30] sm:$0xff] }
  0x12   :  { %1070 = vmatprep.subr.bf16.mxu1 %v1222_v18  ;;  %v39_v54 = vld [vmem:[%s1651_s0 + $0x28] sm:$0xff]  ;;  %v47_v58 = vpack.c.bf16 %v40_v57, %v40_v57  ;;  %v1249_v59 = vld [vmem:[%s1652_s1 + $0x130] sm:$0xff]   ;;  %v1250_v60 = vld [vmem:[%s1652_s1 + $0x178] sm:$0xff]  }
  0x13   :  { %1049 = vmatpush3.bf16.msra.mxu0 %v1221_v17  ;;  %v46_v56 = vpack.c.bf16 %v39_v54, %v39_v54  ;;  %v1251_v61 = vld [vmem:[%s1652_s1 + $0x138] sm:$0xff]   ;;  %v38_v62 = vld [vmem:[%s1651_s0 + $0x20] sm:$0xff] }
  0x14   :  { %1050 = vmatprep.subr.bf16.mxu0 %v1224_v20  ;;  %v45_v63 = vpack.c.bf16 %v38_v62, %v38_v62 }
  0x15   :  { %1071 = vmatpush3.bf16.msra.mxu1 %v1223_v19 }
  0x16   :  { %1072 = vmatprep.subr.bf16.mxu1 %v1226_v22 }
  0x17   :  { %1051 = vmatpush3.bf16.msra.mxu0 %v1225_v21 }
  0x18   :  { %1052 = vmatprep.subr.bf16.mxu0 %v1228_v24 }
  0x19   :  { %1073 = vmatpush3.bf16.msra.mxu1 %v1227_v23 }
  0x1a   :  { %1074 = vmatprep.subr.bf16.mxu1 %v1230_v26 }
  0x1b   :  { %1053 = vmatpush3.bf16.msra.mxu0 %v1229_v25 }
  0x1c   :  { %1054 = vmatprep.subr.bf16.mxu0 %v1232_v28 }
  0x1d   :  { %1075 = vmatpush3.bf16.msra.mxu1 %v1231_v27 }
  0x1e   :  { %1076 = vmatprep.subr.bf16.mxu1 %v1234_v30 }
  0x1f   :  { %1055 = vmatpush3.bf16.msra.mxu0 %v1233_v29 }
  0x20   :  { %1084 = vmatprep.subr.bf16.mxu0 %v1236_v36 }
  0x21   :  { %1077 = vmatpush3.bf16.msra.mxu1 %v1235_v33 }
  0x22   :  { %484 = vmatmul.mubr.bf16.vlgmr.msra.gmra.mrb[0].mxu0 %v41_v35  ;;  %1135 = vmatprep.subr.bf16.mxu1 %v1301_v44 }
  0x23   :  { %1085 = vmatpush3.bf16.msra.mxu0 %v1237_v39  ;;  %563 = vmatprep.mubr.bf16.mxu0 %v46_v56 }
  0x24   :  { %524 = vmatmul.mubr.bf16.vlgmr.msra.gmra.mrb[0].mxu1 %v43_v41  ;;  %1086 = vmatprep.subr.bf16.mxu0 %v1238_v42 }
  0x25   :  { %1137 = vmatprep.mubr.msk.bf16.mxu1 %vm1302_vm0, %v1301_v44  ;;  %1136 = vmatpush3.bf16.msra.mxu1 %v1252_v53 }
  0x26   :  { %1141 = vmatprep.subr.bf16.mxu1 %v1301_v44 }
  0x27   :  { %1087 = vmatpush3.bf16.msra.mxu0 %v1239_v43 }
  0x28   :  { %1088 = vmatprep.subr.bf16.mxu0 %v1240_v45 }
  0x2b   :  { %1089 = vmatpush3.bf16.msra.mxu0 %v1241_v46 }
  0x2c   :  { %1090 = vmatprep.subr.bf16.mxu0 %v1242_v47  ;;  %1138 = vmatmul.mubr.msk.bf16.vlgmr.msra.gmra.mrb[4].mxu1 %vm447_vm1, %v47_v58 }
  0x2d   :  { %1157 = vmatprep.mubr.msk.bf16.mxu1 %vm1302_vm0, %v1301_v44 }
  0x2f   :  { %1091 = vmatpush3.bf16.msra.mxu0 %v1243_v48 }
  0x30   :  { %1092 = vmatprep.subr.bf16.mxu0 %v1244_v49 }
  0x33   :  { %1093 = vmatpush3.bf16.msra.mxu0 %v1245_v50 }
  0x34   :  { %1094 = vmatprep.subr.bf16.mxu0 %v1246_v51 }
  0x37   :  { %1095 = vmatpush3.bf16.msra.mxu0 %v1247_v52 }
  0x38   :  { %1096 = vmatprep.subr.bf16.mxu0 %v1248_v55 }
  0x3b   :  { %1097 = vmatpush3.bf16.msra.mxu0 %v1249_v59 }
  0x3c   :  { %1098 = vmatprep.subr.bf16.mxu0 %v1250_v60 }
  0x3f   :  { %1099 = vmatpush3.bf16.msra.mxu0 %v1251_v61 }
  0x40   :  { %1161 = vmatprep.subr.bf16.mxu0 %v1301_v44 }
  0x42   :  { %564 = vmatmul.mubr.bf16.vlgmr.msra.gmra.mrb[4].mxu0 %v45_v63 }
  0x43   :  { %14 = vsyncpa [#allocation3], 0  ;;  %1177 = vmatprep.mubr.msk.bf16.mxu0 %vm1302_vm0, %v1301_v44  ;;  %v1253_v0 = vld [vmem:[%s1654_s3] sm:$0xff]   ;;  %v1254_v1 = vld [vmem:[%s1654_s3 + $0x8] sm:$0xff]   ;;  %s1303_s19 = smov [#allocation2]  }
  0x44   :  { %1142 = vmatpush3.bf16.msra.mxu1 %v1253_v0  ;;  %v1255_v2 = vld [vmem:[%s1654_s3 + $0x10] sm:$0xff]   ;;  %v1256_v3 = vld [vmem:[%s1654_s3 + $0x18] sm:$0xff]   ;;  %v1257_v4 = vld [vmem:[%s1654_s3 + $0x20] sm:$0xff]   ;;  %s954_s20 = sshll.u32 %s1303_s19, 4  ;;  %s955_s20 = int_to_ptr.vmem [resolvable:$true] %s954_s20 }
  0x45   :  { %1143 = vmatprep.subr.bf16.mxu1 %v1301_v44  ;;  %v1258_v5 = vld [vmem:[%s1654_s3 + $0x28] sm:$0xff]   ;;  %v1259_v6 = vld [vmem:[%s1654_s3 + $0x30] sm:$0xff]   ;;  %v1260_v7 = vld [vmem:[%s1654_s3 + $0x38] sm:$0xff]   ;;  %p1282_p1 = scmp.lt.s32.totalorder %s955_s20, %s955_s20 }
  0x46   :  { %v1261_v8 = vld [vmem:[%s1656_s5] sm:$0xff]   ;;  %v1262_v9 = vld [vmem:[%s1656_s5 + $0x8] sm:$0xff]   ;;  %v1263_v10 = vld [vmem:[%s1656_s5 + $0x10] sm:$0xff]  }
  0x47   :  { %1162 = vmatpush3.bf16.msra.mxu0 %v1261_v8  ;;  %v1264_v11 = vld [vmem:[%s1656_s5 + $0x18] sm:$0xff]   ;;  %v1265_v12 = vld [vmem:[%s1656_s5 + $0x20] sm:$0xff]   ;;  %v1266_v13 = vld [vmem:[%s1656_s5 + $0x28] sm:$0xff]  }
  0x48   :  { %1144 = vmatpush3.bf16.msra.mxu1 %v1254_v1  ;;  %1163 = vmatprep.subr.bf16.mxu0 %v1301_v44  ;;  %v1267_v14 = vld [vmem:[%s1656_s5 + $0x30] sm:$0xff]   ;;  %v962_v16 = vld [vmem:[%s1653_s2] ss:$0 sm:$0xff]  ;;  %v1268_v40 = vld [vmem:[%s1656_s5 + $0x38] sm:$0xff]  }
  0x49   :  { %1145 = vmatprep.subr.bf16.mxu1 %v1301_v44  ;;  %v1269_v41 = vld [vmem:[%s1658_s7] sm:$0xff]   ;;  %v1270_v42 = vld [vmem:[%s1658_s7 + $0x8] sm:$0xff]   ;;  %v1271_v43 = vld [vmem:[%s1658_s7 + $0x10] sm:$0xff]  }
  0x4a   :  { %v1272_v45 = vld [vmem:[%s1658_s7 + $0x18] sm:$0xff]   ;;  %v1273_v46 = vld [vmem:[%s1658_s7 + $0x20] sm:$0xff]   ;;  %v1274_v47 = vld [vmem:[%s1658_s7 + $0x28] sm:$0xff]  }
  0x4b   :  { %1164 = vmatpush3.bf16.msra.mxu0 %v1262_v9  ;;  %v1275_v48 = vld [vmem:[%s1658_s7 + $0x30] sm:$0xff]   ;;  %v1013_v49 = vld [vmem:[%s1655_s4] ss:$0 sm:$0xff]  ;;  %v1276_v56 = vld [vmem:[%s1658_s7 + $0x38] sm:$0xff]  }
  0x4c   :  { %1146 = vmatpush3.bf16.msra.mxu1 %v1255_v2  ;;  %1165 = vmatprep.subr.bf16.mxu0 %v1301_v44  ;;  %v1031_v63 = vld [vmem:[%s1659_s8] ss:$0 sm:$0xff] }
  0x4d   :  { %1147 = vmatprep.subr.bf16.mxu1 %v1301_v44 }
  0x4f   :  { %1166 = vmatpush3.bf16.msra.mxu0 %v1263_v10 }
  0x50   :  { %1148 = vmatpush3.bf16.msra.mxu1 %v1256_v3  ;;  %1167 = vmatprep.subr.bf16.mxu0 %v1301_v44 }
  0x51   :  { %1149 = vmatprep.subr.bf16.mxu1 %v1301_v44 }
  0x53   :  { %1168 = vmatpush3.bf16.msra.mxu0 %v1264_v11 }
  0x54   :  { %1150 = vmatpush3.bf16.msra.mxu1 %v1257_v4  ;;  %1169 = vmatprep.subr.bf16.mxu0 %v1301_v44 }
  0x55   :  { %1151 = vmatprep.subr.bf16.mxu1 %v1301_v44 }
  0x57   :  { %1170 = vmatpush3.bf16.msra.mxu0 %v1265_v12 }
  0x58   :  { %1152 = vmatpush3.bf16.msra.mxu1 %v1258_v5  ;;  %1171 = vmatprep.subr.bf16.mxu0 %v1301_v44 }
  0x59   :  { %1153 = vmatprep.subr.bf16.mxu1 %v1301_v44 }
  0x5b   :  { %1172 = vmatpush3.bf16.msra.mxu0 %v1266_v13 }
  0x5c   :  { %1154 = vmatpush3.bf16.msra.mxu1 %v1259_v6  ;;  %1173 = vmatprep.subr.bf16.mxu0 %v1301_v44 }
  0x5d   :  { %1155 = vmatprep.subr.bf16.mxu1 %v1301_v44 }
  0x5f   :  { %1174 = vmatpush3.bf16.msra.mxu0 %v1267_v14 }
  0x60   :  { %1156 = vmatpush3.bf16.msra.mxu1 %v1260_v7  ;;  %1175 = vmatprep.subr.bf16.mxu0 %v1301_v44 }
  0x61   :  { %1181 = vmatprep.subr.bf16.mxu1 %v1301_v44 }
  0x63   :  { %1176 = vmatpush3.bf16.msra.mxu0 %v1268_v40 }
  0xf5   :  { %v1056_v15 = vpop.f32.mrb[0].mxu0 }
  0xf6   :  { %v1057_v17 = vpop.f32.mrb[1].mxu0 }
  0xf7   :  { %v1058_v18 = vadd.f32 %v1057_v17, %v1056_v15  ;;  %v1059_v19 = vpop.f32.mrb[2].mxu0  ;;  %v1078_v20 = vpop.f32.mrb[0].mxu1 }
  0xf8   :  { %v1060_v21 = vpop.f32.mrb[3].mxu0  ;;  %v1079_v23 = vpop.f32.mrb[1].mxu1 }
  0xf9   :  { %v486_v22 = vadd.f32 %v1058_v18, %v962_v16  ;;  %v1080_v24 = vadd.f32 %v1079_v23, %v1078_v20  ;;  %v1081_v25 = vpop.f32.mrb[2].mxu1 }
  0xfa   :  { %v1082_v26 = vpop.f32.mrb[3].mxu1 }
  0xfb   :  { %v526_v27 = vadd.f32 %v1080_v24, %v486_v22 }
  0xff   :  { %v605_v28 = vpop.f32.mrb[4].mxu1 }
 0x100   :  { %v1139_v29 = vpop.f32.mrb[5].mxu1 }
 0x101   :  { %v608_v30 = vpop.f32.mrb[6].mxu1 }
 0x102   :  { %v1140_v31 = vpop.f32.mrb[7].mxu1 }
 0x115   :  { %v1100_v32 = vpop.f32.mrb[4].mxu0 }
 0x116   :  { %v1101_v33 = vpop.f32.mrb[5].mxu0 }
 0x117   :  { %v1102_v34 = vadd.f32 %v1101_v33, %v1100_v32  ;;  %v1103_v35 = vpop.f32.mrb[6].mxu0 }
 0x118   :  { %v1104_v36 = vpop.f32.mrb[7].mxu0 }
 0x119   :  { %v566_v37 = vadd.f32 %v1102_v34, %v526_v27 }
 0x11b   :  { %v606_v38 = vadd.f32 %v605_v28, %v566_v37 }
 0x11d   :  { %v611_v39 = vpack.c.bf16 %v606_v38, %v606_v38 }
 0x11f   :  { %1158 = vmatmul.mubr.bf16.vlgmr.msra.gmra.mrb[8].mxu1 %v611_v39 }
 0x120   :  { %1197 = vmatprep.mubr.msk.bf16.mxu1 %vm1302_vm0, %v1301_v44  ;;  %1182 = vmatpush3.bf16.msra.mxu1 %v1269_v41 }
 0x121   :  { %1183 = vmatprep.subr.bf16.mxu1 %v1301_v44 }
 0x124   :  { %1184 = vmatpush3.bf16.msra.mxu1 %v1270_v42 }
 0x125   :  { %1185 = vmatprep.subr.bf16.mxu1 %v1301_v44 }
 0x128   :  { %1186 = vmatpush3.bf16.msra.mxu1 %v1271_v43 }
 0x129   :  { %1187 = vmatprep.subr.bf16.mxu1 %v1301_v44 }
 0x12c   :  { %1188 = vmatpush3.bf16.msra.mxu1 %v1272_v45 }
 0x12d   :  { %1189 = vmatprep.subr.bf16.mxu1 %v1301_v44 }
 0x130   :  { %1190 = vmatpush3.bf16.msra.mxu1 %v1273_v46 }
 0x131   :  { %1191 = vmatprep.subr.bf16.mxu1 %v1301_v44 }
 0x134   :  { %1192 = vmatpush3.bf16.msra.mxu1 %v1274_v47 }
 0x135   :  { %1193 = vmatprep.subr.bf16.mxu1 %v1301_v44 }
 0x138   :  { %1194 = vmatpush3.bf16.msra.mxu1 %v1275_v48 }
 0x139   :  { %1195 = vmatprep.subr.bf16.mxu1 %v1301_v44  ;;  %v1022_v44 = vld [vmem:[%s1657_s6] ss:$0 sm:$0xff]  ;;  %s1277_s6 = scalar_lea.vmem %s955_s20, 128 }
 0x13a   :  { %p1278_p0 = scmp.ne.s32.totalorder %s955_s20, %s1277_s6  ;;  %p1283_p2 = scmp.lt.s32.totalorder %s1277_s6, %s1277_s6 }
 0x13c   :  { %1196 = vmatpush3.bf16.msra.mxu1 %v1276_v56  ;;  %p1284_p3 = por %p1283_p2, %p1282_p1 }
 0x13e   :  { %p1285_p4 = pnand %p1284_p3, %p1278_p0 }
 0x1f2   :  { %v717_v50 = vpop.f32.mrb[8].mxu1 }
 0x1f3   :  { %v718_v51 = vadd.f32 %v1013_v49, %v717_v50  ;;  %v1159_v52 = vpop.f32.mrb[9].mxu1 }
 0x1f4   :  { %v720_v53 = vpop.f32.mrb[10].mxu1 }
 0x1f5   :  { %v723_v54 = vpack.c.bf16 %v718_v51, %v718_v51  ;;  %v1160_v55 = vpop.f32.mrb[11].mxu1 }
 0x1f7   :  { %1178 = vmatmul.mubr.bf16.vlgmr.msra.gmra.mrb[8].mxu0 %v723_v54 }
 0x2ca   :  { %v829_v57 = vpop.f32.mrb[8].mxu0 }
 0x2cb   :  { %v830_v58 = vadd.f32 %v1022_v44, %v829_v57  ;;  %v1179_v59 = vpop.f32.mrb[9].mxu0 }
 0x2cc   :  { %v832_v60 = vpop.f32.mrb[10].mxu0 }
 0x2cd   :  { %v835_v61 = vpack.c.bf16 %v830_v58, %v830_v58  ;;  %v1180_v62 = vpop.f32.mrb[11].mxu0 }
 0x2cf   :  { %1198 = vmatmul.mubr.bf16.vlgmr.msra.gmra.mrb[12].mxu1 %v835_v61 }
 0x3a2   :  { %v941_v0 = vpop.f32.mrb[12].mxu1 }
 0x3a3   :  { %v942_v1 = vadd.f32 %v1031_v63, %v941_v0  ;;  %v1199_v2 = vpop.f32.mrb[13].mxu1 }
 0x3a4   :  { %v944_v3 = vpop.f32.mrb[14].mxu1 }
 0x3a5   :  { %947 = vst [vmem:[#allocation2] sm:$0xff] %v942_v1  ;;  %v1200_v4 = vpop.f32.mrb[15].mxu1 }
 0x3a6   :  { %1288 = shalt.err (!%p1285_p4)
}
 0x3a7   :  { %s1289_s8 = scalar_lea.hbm %s1660_s9, 128 }
 0x3a8   :  { %p1290_p5 = scmp.ne.s32.totalorder %s1660_s9, %s1289_s8  ;;  %p1293_p6 = scmp.lt.u32.totalorder %s1289_s8, %s1660_s9 }
 0x3aa   :  { %p1295_p7 = pnand %p1293_p6, %p1290_p5 }
 0x3ac   :  { %1298 = shalt.err (!%p1295_p7)
}
 0x3ad   :  { %957 = dma.vmem_to_hbm [thread:$0]  %s955_s20, 128, %s1660_s9, [#allocation3]  }
 0x3ae   :  { %1299 = dma.done.wait [#allocation3], 128  }
 0x3af   :  { %1300 = vsyncadd [#allocation3], 4294967168 }
 0x3b0   :  { %961 = vsyncpa [#allocation3], 1 }

</bundles_post_ra>
